<compile_context>
chip_gen: v7x
topology: tpu7x:2x2x1
jax: 0.10.0
libtpu: 0.0.40
codegen_flags: <defaults>
</compile_context>

<pallas_src>
import math

import jax
import jax.numpy as jnp
from jax.experimental import pallas as pl
from jax.experimental.pallas import tpu as pltpu


def _round_up(x: int, m: int) -> int:
    return ((x + m - 1) // m) * m


def _make_mapping_kernel(num_mapping_layers: int):
    """Kernel: z -> (Linear+ReLU)*L -> affine, single lane-dense output."""

    def kernel(*refs):
        # refs: z, (W, b) * L, Wa, ba, out
        out_ref = refs[-1]
        z = refs[0][...]                          # (tile_b, z_size), f32
        idx = 1
        for _ in range(num_mapping_layers):
            w = refs[idx][...]                    # (K, z_pad)
            b = refs[idx + 1][...]                # (1, z_pad), f32
            z = jnp.dot(z.astype(w.dtype), w,
                        preferred_element_type=jnp.float32) + b
            z = jnp.maximum(z, 0.0)
            idx += 2
        wa = refs[idx][...]                       # (K_aff, out2_pad)
        ba = refs[idx + 1][...]                   # (1, out2_pad), f32
        out_ref[...] = jnp.dot(z.astype(wa.dtype), wa,
                               preferred_element_type=jnp.float32) + ba

    return kernel


def _choose_tiling(B, z_size, z_pad, out2_pad, param_bytes):
    """Adaptive batch tile: big tiles (fewer grid steps), minimal row padding,
    shrunk if resident VMEM would crowd v7x's 64 MiB."""
    budget = 48 << 20                 # leave headroom on v7x (64 MiB physical)
    cap = 512
    while cap > 8:
        resident = (2 * param_bytes                          # double-buffered params
                    + 2 * 4 * cap * (z_size + out2_pad)      # in/out double buffers
                    + 4 * cap * z_pad)                       # live f32 activation
        if resident <= budget:
            break
        cap //= 2
    if B <= cap:
        tile_b = _round_up(max(B, 1), 8)
        n_tiles = 1
    else:
        n_tiles = -(-B // cap)                               # ceil
        tile_b = _round_up(-(-B // n_tiles), 8)
    return tile_b, n_tiles


def _build_forward(num_layers: int, z_size: int, out_size: int,
                   z_pad: int, out2_pad: int):
    """Returns a pure function (z, params) -> (mean, var) suitable for jit."""
    kernel = _make_mapping_kernel(num_layers)

    def forward(z, params):
        B = z.shape[0]
        hidden = params["hidden"]
        wa, ba = params["wa"], params["ba"]

        param_bytes = sum(int(a.size) * a.dtype.itemsize
                          for pair in hidden for a in pair)
        param_bytes += int(wa.size) * wa.dtype.itemsize
        param_bytes += int(ba.size) * ba.dtype.itemsize

        tile_b, n_tiles = _choose_tiling(B, z_size, z_pad, out2_pad, param_bytes)
        b_pad = tile_b * n_tiles

        zf = z.astype(jnp.float32)
        if b_pad != B:                            # rows only; lanes stay unpadded
            zf = jnp.pad(zf, ((0, b_pad - B), (0, 0)))

        flat = [zf]
        in_specs = [pl.BlockSpec((tile_b, z_size), lambda i: (i, 0))]
        for (w, b) in hidden:
            flat.append(w)
            flat.append(b)
            in_specs.append(pl.BlockSpec(w.shape, lambda i: (0, 0)))
            in_specs.append(pl.BlockSpec(b.shape, lambda i: (0, 0)))
        flat.append(wa)
        flat.append(ba)
        in_specs.append(pl.BlockSpec(wa.shape, lambda i: (0, 0)))
        in_specs.append(pl.BlockSpec(ba.shape, lambda i: (0, 0)))

        out_spec = pl.BlockSpec((tile_b, out2_pad), lambda i: (i, 0))

        # Cost estimate (advisory).
        flops = 0
        if num_layers > 0:
            flops += 2 * b_pad * z_size * z_pad
            flops += 2 * b_pad * z_pad * z_pad * (num_layers - 1)
            k_last = z_pad
        else:
            k_last = z_size
        flops += 2 * b_pad * k_last * out2_pad
        bytes_accessed = param_bytes + 4 * b_pad * (z_size + out2_pad)

        resident = (2 * param_bytes + 2 * 4 * tile_b * (z_size + out2_pad)
                    + 4 * tile_b * z_pad)
        vmem_limit = int(min(100 << 20, max(32 << 20, 2 * resident)))

        x = pl.pallas_call(
            kernel,
            out_shape=jax.ShapeDtypeStruct((b_pad, out2_pad), jnp.float32),
            grid=(n_tiles,),
            in_specs=in_specs,
            out_specs=out_spec,
            compiler_params=pltpu.CompilerParams(
                # Note: only helps on multi-TC parts (v7x); on v5e/v6e the
                # grid is a serial loop, hence the large adaptive tile above.
                dimension_semantics=("parallel",),
                vmem_limit_bytes=vmem_limit),
            cost_estimate=pl.CostEstimate(
                flops=int(flops), transcendentals=0,
                bytes_accessed=int(bytes_accessed)),
        )(*flat)

        # Slice back to real batch / feature width; split + NCHW-broadcast dims.
        x = x[:B, :2 * out_size]
        mean = x[:, :out_size][..., None, None]
        var = x[:, out_size:][..., None, None]
        return mean, var

    return forward


class MappingPallas:
    """JAX/Pallas equivalent of the PyTorch `Mapping` module."""

    def __init__(self, z_size, out_size, layername=None, mapping_layers=0,
                 key=None, param_dtype=jnp.float32):
        if key is None:
            key = jax.random.PRNGKey(0)
        self.z_size = z_size
        self.out_size = out_size
        self.layername = layername
        self.num_mapping_layers = mapping_layers

        self.z_pad = max(128, _round_up(z_size, 128))
        self.out2_pad = max(128, _round_up(2 * out_size, 128))

        # --- unpadded params (torch.nn.Linear default init), kept for reference ---
        keys = jax.random.split(key, 2 * mapping_layers + 2)
        bound = 1.0 / math.sqrt(z_size)
        self.weights = []  # list of (W (Z,Z), b (1,Z))
        k_idx = 0
        for _ in range(mapping_layers):
            w = jax.random.uniform(keys[k_idx], (z_size, z_size),
                                   jnp.float32, -bound, bound)
            b = jax.random.uniform(keys[k_idx + 1], (1, z_size),
                                   jnp.float32, -bound, bound)
            self.weights.append((w, b))
            k_idx += 2
        wa = jax.random.uniform(keys[k_idx], (z_size, 2 * out_size),
                                jnp.float32, -bound, bound)
        ba = jnp.concatenate(
            [jnp.zeros((out_size,), jnp.float32),
             jnp.ones((out_size,), jnp.float32)]).reshape(1, 2 * out_size)
        self.affine_w = wa
        self.affine_b = ba

        # --- zero-padded params (output lanes -> multiples of 128).
        # First matmul keeps its real K = z_size rows so z needs no padding.
        hidden_padded = []
        for layer_idx, (w, b) in enumerate(self.weights):
            k_in = z_size if layer_idx == 0 else self.z_pad
            wp = jnp.zeros((k_in, self.z_pad), jnp.float32)
            wp = wp.at[:z_size, :z_size].set(w)
            bp = jnp.zeros((1, self.z_pad), jnp.float32)
            bp = bp.at[:, :z_size].set(b)
            hidden_padded.append((wp.astype(param_dtype), bp))
        k_aff = z_size if mapping_layers == 0 else self.z_pad
        wap = jnp.zeros((k_aff, self.out2_pad), jnp.float32)
        wap = wap.at[:z_size, :2 * out_size].set(wa)
        bap = jnp.zeros((1, self.out2_pad), jnp.float32)
        bap = bap.at[:, :2 * out_size].set(ba)
        self._padded_params = {"hidden": hidden_padded,
                               "wa": wap.astype(param_dtype), "ba": bap}

        # Build + cache the jitted forward once (traces once per input shape).
        # TODO(synk): the PyTorch `params=None` MetaModule override path
        # (meta-learning fast weights) is not replicated; stored params are used.
        self._forward = jax.jit(_build_forward(
            mapping_layers, z_size, out_size, self.z_pad, self.out2_pad))

    def __call__(self, z):
        return self._forward(z, self._padded_params)


if __name__ == "__main__":
    key = jax.random.PRNGKey(0)
    k_param, k_z = jax.random.split(key)

    B = 8          # batch
    Z = 32         # z_size
    OUT = 16       # out_size
    L = 2          # mapping_layers

    model = MappingPallas(z_size=Z, out_size=OUT, layername="texlayer",
                          mapping_layers=L, key=k_param)
    z = jax.random.normal(k_z, (B, Z), jnp.float32)

    mean, var = model(z)
    jax.block_until_ready((mean, var))

    assert mean.shape == (B, OUT, 1, 1), mean.shape
    assert var.shape == (B, OUT, 1, 1), var.shape

    # Pure-JAX reference (unpadded params) for sanity check.
    z_ref = z
    for (w, b) in model.weights:
        z_ref = jnp.maximum(z_ref @ w + b, 0.0)
    x_ref = z_ref @ model.affine_w + model.affine_b
    mean_ref = x_ref[:, :OUT][..., None, None]
    var_ref = x_ref[:, OUT:][..., None, None]
    assert jnp.allclose(mean, mean_ref, atol=1e-5), "mean mismatch"
    assert jnp.allclose(var, var_ref, atol=1e-5), "var mismatch"

    # Second call exercises the cached (jitted) path; bit-exact check.
    mean2, var2 = model(z)
    jax.block_until_ready((mean2, var2))
    assert bool(jnp.array_equal(mean2, mean)), "cache path mismatch"
    assert bool(jnp.array_equal(var2, var)), "cache path mismatch"

    print("KERNEL_OK")
</pallas_src>

<mosaic_0001>
module attributes {stable_mosaic.version = 11 : i64} {
  func.func @kernel(%arg0: i32, %arg1: memref<8x32xf32, #tpu.memory_space<vmem>>, %arg2: memref<32x128xf32, #tpu.memory_space<vmem>>, %arg3: memref<1x128xf32, #tpu.memory_space<vmem>>, %arg4: memref<128x128xf32, #tpu.memory_space<vmem>>, %arg5: memref<1x128xf32, #tpu.memory_space<vmem>>, %arg6: memref<128x128xf32, #tpu.memory_space<vmem>>, %arg7: memref<1x128xf32, #tpu.memory_space<vmem>>, %arg8: memref<8x128xf32, #tpu.memory_space<vmem>>) attributes {dimension_semantics = [#tpu.dimension_semantics<parallel>], iteration_bounds = array<i64: 1>, scalar_prefetch = 0 : i64, scratch_operands = 0 : i64, tpu.core_type = #tpu.core_type<tc>, window_params = [{transform_indices = @transform_0, window_bounds = array<i64: 8, 32>}, {pipeline_mode = #tpu.pipeline_mode<synchronous>, transform_indices = @transform_1, window_bounds = array<i64: 32, 128>}, {pipeline_mode = #tpu.pipeline_mode<synchronous>, transform_indices = @transform_2, window_bounds = array<i64: 1, 128>}, {pipeline_mode = #tpu.pipeline_mode<synchronous>, transform_indices = @transform_3, window_bounds = array<i64: 128, 128>}, {pipeline_mode = #tpu.pipeline_mode<synchronous>, transform_indices = @transform_4, window_bounds = array<i64: 1, 128>}, {pipeline_mode = #tpu.pipeline_mode<synchronous>, transform_indices = @transform_5, window_bounds = array<i64: 128, 128>}, {pipeline_mode = #tpu.pipeline_mode<synchronous>, transform_indices = @transform_6, window_bounds = array<i64: 1, 128>}, {transform_indices = @transform_7, window_bounds = array<i64: 8, 128>}]} {
    %c0 = arith.constant 0 : index
    %c0_0 = arith.constant 0 : index
    %0 = vector.load %arg1[%c0, %c0_0] : memref<8x32xf32, #tpu.memory_space<vmem>>, vector<8x32xf32>
    %c0_1 = arith.constant 0 : index
    %c0_2 = arith.constant 0 : index
    %1 = vector.load %arg2[%c0_1, %c0_2] : memref<32x128xf32, #tpu.memory_space<vmem>>, vector<32x128xf32>
    %c0_3 = arith.constant 0 : index
    %c0_4 = arith.constant 0 : index
    %2 = vector.load %arg3[%c0_3, %c0_4] : memref<1x128xf32, #tpu.memory_space<vmem>>, vector<1x128xf32>
    %cst = arith.constant dense<0.000000e+00> : vector<8x128xf32>
    %3 = tpu.matmul %0, %1, %cst {dimension_numbers = #tpu.dot_dimension_numbers<[1], [0], [0], [1], [0, 0, 1, 1], [], []>} : vector<8x32xf32>, vector<32x128xf32>, vector<8x128xf32> -> vector<8x128xf32>
    %4 = vector.broadcast %2 : vector<1x128xf32> to vector<8x128xf32>
    %5 = arith.addf %3, %4 : vector<8x128xf32>
    %cst_5 = arith.constant 0.000000e+00 : f32
    %6 = vector.broadcast %cst_5 : f32 to vector<8x128xf32>
    %7 = arith.maximumf %5, %6 : vector<8x128xf32>
    %c0_6 = arith.constant 0 : index
    %c0_7 = arith.constant 0 : index
    %8 = vector.load %arg4[%c0_6, %c0_7] : memref<128x128xf32, #tpu.memory_space<vmem>>, vector<128x128xf32>
    %c0_8 = arith.constant 0 : index
    %c0_9 = arith.constant 0 : index
    %9 = vector.load %arg5[%c0_8, %c0_9] : memref<1x128xf32, #tpu.memory_space<vmem>>, vector<1x128xf32>
    %cst_10 = arith.constant dense<0.000000e+00> : vector<8x128xf32>
    %10 = tpu.matmul %7, %8, %cst_10 {dimension_numbers = #tpu.dot_dimension_numbers<[1], [0], [0], [1], [0, 0, 1, 1], [], []>} : vector<8x128xf32>, vector<128x128xf32>, vector<8x128xf32> -> vector<8x128xf32>
    %11 = vector.broadcast %9 : vector<1x128xf32> to vector<8x128xf32>
    %12 = arith.addf %10, %11 : vector<8x128xf32>
    %cst_11 = arith.constant 0.000000e+00 : f32
    %13 = vector.broadcast %cst_11 : f32 to vector<8x128xf32>
    %14 = arith.maximumf %12, %13 : vector<8x128xf32>
    %c0_12 = arith.constant 0 : index
    %c0_13 = arith.constant 0 : index
    %15 = vector.load %arg6[%c0_12, %c0_13] : memref<128x128xf32, #tpu.memory_space<vmem>>, vector<128x128xf32>
    %c0_14 = arith.constant 0 : index
    %c0_15 = arith.constant 0 : index
    %16 = vector.load %arg7[%c0_14, %c0_15] : memref<1x128xf32, #tpu.memory_space<vmem>>, vector<1x128xf32>
    %cst_16 = arith.constant dense<0.000000e+00> : vector<8x128xf32>
    %17 = tpu.matmul %14, %15, %cst_16 {dimension_numbers = #tpu.dot_dimension_numbers<[1], [0], [0], [1], [0, 0, 1, 1], [], []>} : vector<8x128xf32>, vector<128x128xf32>, vector<8x128xf32> -> vector<8x128xf32>
    %18 = vector.broadcast %16 : vector<1x128xf32> to vector<8x128xf32>
    %19 = arith.addf %17, %18 : vector<8x128xf32>
    %c0_17 = arith.constant 0 : index
    %c0_18 = arith.constant 0 : index
    %20 = vector.load %arg8[%c0_17, %c0_18] : memref<8x128xf32, #tpu.memory_space<vmem>>, vector<8x128xf32>
    tpu.vector_store %arg8[%c0_17, %c0_18], %19 {strides = array<i32>} : memref<8x128xf32, #tpu.memory_space<vmem>>, vector<8x128xf32>,
    return
  }
  func.func @transform_0(%arg0: i32) -> (i32, i32) {
    %c0_i32 = arith.constant 0 : i32
    %c0_i32_0 = arith.constant 0 : i32
    return %arg0, %c0_i32 : i32, i32
  }
  func.func @transform_1(%arg0: i32) -> (i32, i32) {
    %c0_i32 = arith.constant 0 : i32
    %c0_i32_0 = arith.constant 0 : i32
    %c0_i32_1 = arith.constant 0 : i32
    return %c0_i32, %c0_i32_0 : i32, i32
  }
  func.func @transform_2(%arg0: i32) -> (i32, i32) {
    %c0_i32 = arith.constant 0 : i32
    %c0_i32_0 = arith.constant 0 : i32
    %c0_i32_1 = arith.constant 0 : i32
    return %c0_i32, %c0_i32_0 : i32, i32
  }
  func.func @transform_3(%arg0: i32) -> (i32, i32) {
    %c0_i32 = arith.constant 0 : i32
    %c0_i32_0 = arith.constant 0 : i32
    %c0_i32_1 = arith.constant 0 : i32
    return %c0_i32, %c0_i32_0 : i32, i32
  }
  func.func @transform_4(%arg0: i32) -> (i32, i32) {
    %c0_i32 = arith.constant 0 : i32
    %c0_i32_0 = arith.constant 0 : i32
    %c0_i32_1 = arith.constant 0 : i32
    return %c0_i32, %c0_i32_0 : i32, i32
  }
  func.func @transform_5(%arg0: i32) -> (i32, i32) {
    %c0_i32 = arith.constant 0 : i32
    %c0_i32_0 = arith.constant 0 : i32
    %c0_i32_1 = arith.constant 0 : i32
    return %c0_i32, %c0_i32_0 : i32, i32
  }
  func.func @transform_6(%arg0: i32) -> (i32, i32) {
    %c0_i32 = arith.constant 0 : i32
    %c0_i32_0 = arith.constant 0 : i32
    %c0_i32_1 = arith.constant 0 : i32
    return %c0_i32, %c0_i32_0 : i32, i32
  }
  func.func @transform_7(%arg0: i32) -> (i32, i32) {
    %c0_i32 = arith.constant 0 : i32
    %c0_i32_0 = arith.constant 0 : i32
    return %arg0, %c0_i32 : i32, i32
  }
}

</mosaic_0001>

<bundles_post_ra>
// kernel: forward.1
= control target key start
LH: loop header
LB: loop body
LE: loop exit
PB: predicated region body
PF: predicated region fallthrough
CT: control target
= control target key end

     0   :  { %12 = vsyncpa [#allocation3], 0  ;;  %s781_s0 = inlined_call_operand.hbm [shape: f32[8,32], index: 0, kind: input, shape index: {}]   ;;  %s782_s1 = inlined_call_operand.hbm [shape: f32[32,128], index: 1, kind: input, shape index: {}]   ;;  %s783_s2 = inlined_call_operand.vmem [shape: f32[1,128], index: 2, kind: input, shape index: {}]   ;;  %s784_s3 = inlined_call_operand.hbm [shape: f32[128,128], index: 3, kind: input, shape index: {}]   ;;  %s785_s4 = inlined_call_operand.vmem [shape: f32[1,128], index: 4, kind: input, shape index: {}]   ;;  %s786_s5 = inlined_call_operand.hbm [shape: f32[128,128], index: 5, kind: input, shape index: {}]   ;;  %s787_s6 = inlined_call_operand.vmem [shape: f32[1,128], index: 6, kind: input, shape index: {}]   ;;  %s788_s7 = inlined_call_operand.vmem [shape: f32[8,128], index: 7, kind: output, shape index: {}]  }
   0x1   :  { %13 = vsyncpa [#allocation5], 0 }
   0x2   :  { %14 = vsyncpa [#allocation8], 0  ;;  %s642_s24 = smov [#allocation4]   ;;  %s548_s28 = scalar_lea.hbm %s782_s1, 512 }
   0x3   :  { %s30_s25 = sshll.u32 %s642_s24, 4  ;;  %p549_p0 = scmp.ne.s32.totalorder %s782_s1, %s548_s28  ;;  %s31_s25 = int_to_ptr.vmem [resolvable:$true] %s30_s25 }
   0x4   :  { %p552_p1 = scmp.lt.u32.totalorder %s548_s28, %s782_s1 }
   0x6   :  { %p554_p2 = pnand %p552_p1, %p549_p0 }
   0x8   :  { %557 = shalt.err (!%p554_p2)
}
   0x9   :  { %s558_s10 = scalar_lea.vmem %s31_s25, 512  ;;  %p563_p4 = scmp.lt.s32.totalorder %s31_s25, %s31_s25 }
   0xa   :  { %p559_p3 = scmp.ne.s32.totalorder %s31_s25, %s558_s10  ;;  %p564_p5 = scmp.lt.s32.totalorder %s558_s10, %s558_s10 }
   0xc   :  { %p565_p6 = por %p564_p5, %p563_p4 }
   0xe   :  { %p566_p7 = pnand %p565_p6, %p559_p3 }
  0x10   :  { %569 = shalt.err (!%p566_p7)
}
  0x11   :  { %s643_s11 = smov 128   ;;  %s644_s12 = smov 8  }
  0x12   :  { %36 = dma.hbm_to_vmem [thread:$0]  %s782_s1, 512, %s31_s25, [#allocation5], %s643_s11, %s643_s11, %s644_s12  }
  0x13   :  { %s645_s15 = smov [#allocation2]   ;;  %s646_s17 = smov [#allocation6]  }
  0x14   :  { %s21_s16 = sshll.u32 %s645_s15, 4  ;;  %s44_s18 = sshll.u32 %s646_s17, 4  ;;  %s22_s16 = int_to_ptr.vmem [resolvable:$true] %s21_s16  ;;  %s45_s18 = int_to_ptr.vmem [resolvable:$true] %s44_s18 }
  0x15   :  { %s570_s21 = scalar_lea.hbm %s781_s0, 128 }
  0x16   :  { %p571_p8 = scmp.ne.s32.totalorder %s781_s0, %s570_s21  ;;  %p574_p9 = scmp.lt.u32.totalorder %s570_s21, %s781_s0 }
  0x18   :  { %p576_p10 = pnand %p574_p9, %p571_p8 }
  0x1a   :  { %579 = shalt.err (!%p576_p10)
}
  0x1b   :  { %s580_s1 = scalar_lea.vmem %s22_s16, 128  ;;  %p585_p12 = scmp.lt.s32.totalorder %s22_s16, %s22_s16 }
  0x1c   :  { %p581_p11 = scmp.ne.s32.totalorder %s22_s16, %s580_s1  ;;  %p586_p13 = scmp.lt.s32.totalorder %s580_s1, %s580_s1 }
  0x1e   :  { %p587_p0 = por %p586_p13, %p585_p12 }
  0x20   :  { %p588_p1 = pnand %p587_p0, %p581_p11 }
  0x22   :  { %591 = shalt.err (!%p588_p1)
}
  0x23   :  { %24 = dma.hbm_to_vmem [thread:$0]  %s781_s0, 128, %s22_s16, [#allocation3]  }
  0x24   :  { %s592_s30 = scalar_lea.hbm %s784_s3, 2048 }
  0x25   :  { %p593_p2 = scmp.ne.s32.totalorder %s784_s3, %s592_s30  ;;  %p596_p3 = scmp.lt.u32.totalorder %s592_s30, %s784_s3 }
  0x27   :  { %p598_p4 = pnand %p596_p3, %p593_p2 }
  0x29   :  { %601 = shalt.err (!%p598_p4)
}
  0x2a   :  { %s602_s14 = scalar_lea.vmem %s45_s18, 2048  ;;  %p607_p6 = scmp.lt.s32.totalorder %s45_s18, %s45_s18 }
  0x2b   :  { %p603_p5 = scmp.ne.s32.totalorder %s45_s18, %s602_s14  ;;  %p608_p7 = scmp.lt.s32.totalorder %s602_s14, %s602_s14 }
  0x2d   :  { %p609_p8 = por %p608_p7, %p607_p6 }
  0x2f   :  { %p610_p9 = pnand %p609_p8, %p603_p5 }
  0x31   :  { %613 = shalt.err (!%p610_p9)
}
  0x32   :  { %50 = dma.hbm_to_vmem [thread:$0]  %s784_s3, 2048, %s45_s18, [#allocation5], %s643_s11, %s643_s11, %s644_s12  }
  0x33   :  { %s647_s16 = smov [#allocation7]   ;;  %s614_s21 = scalar_lea.hbm %s786_s5, 2048 }
  0x34   :  { %s58_s17 = sshll.u32 %s647_s16, 4  ;;  %p615_p10 = scmp.ne.s32.totalorder %s786_s5, %s614_s21  ;;  %s59_s17 = int_to_ptr.vmem [resolvable:$true] %s58_s17 }
  0x35   :  { %p618_p11 = scmp.lt.u32.totalorder %s614_s21, %s786_s5 }
  0x37   :  { %p620_p12 = pnand %p618_p11, %p615_p10 }
  0x39   :  { %623 = shalt.err (!%p620_p12)
}
  0x3a   :  { %s624_s1 = scalar_lea.vmem %s59_s17, 2048  ;;  %p629_p0 = scmp.lt.s32.totalorder %s59_s17, %s59_s17 }
  0x3b   :  { %p625_p13 = scmp.ne.s32.totalorder %s59_s17, %s624_s1  ;;  %p630_p1 = scmp.lt.s32.totalorder %s624_s1, %s624_s1 }
  0x3d   :  { %p631_p2 = por %p630_p1, %p629_p0 }
  0x3f   :  { %p632_p3 = pnand %p631_p2, %p625_p13 }
  0x41   :  { %635 = shalt.err (!%p632_p3)
}
  0x42   :  { %64 = dma.hbm_to_vmem [thread:$0]  %s786_s5, 2048, %s59_s17, [#allocation8], %s643_s11, %s643_s11, %s644_s12  }
  0x43   :  { %636 = dma.done.wait [#allocation3], 128  }
  0x44   :  { %637 = vsyncadd [#allocation3], 4294967168 }
  0x45   :  { %638 = dma.done.wait [#allocation5], 2560  }
  0x46   :  { %639 = vsyncadd [#allocation5], 4294964736 }
  0x47   :  { %640 = dma.done.wait [#allocation8], 2048  }
  0x48   :  { %641 = vsyncadd [#allocation8], 4294965248  ;;  %v648_v0 = vmov 0.0|0.0   ;;  %vm649_vm0 = vmmov 0   ;;  %v650_v1 = vmov 0.0   ;;  %v80_v2 = vld [vmem:[#allocation4] sm:$0xff] }
  0x49   :  { %485 = vmatprep.subr.bf16.mxu0 %v648_v0  ;;  %412 = vmatprep.mubr.msk.f32.mxu0 %vm649_vm0, %v650_v1  ;;  %v81_v3 = vld [vmem:[#allocation4 + $0x8] sm:$0xff]  ;;  %v82_v4 = vld [vmem:[#allocation4 + $0x10] sm:$0xff]  ;;  %v83_v6 = vld [vmem:[#allocation4 + $0x18] sm:$0xff]  ;;  %vm91_vm1 = vcmask 261120  }
  0x4a   :  { %491 = vmatprep.subr.bf16.mxu1 %v648_v0  ;;  %447 = vmatprep.mubr.msk.f32.mxu1 %vm649_vm0, %v650_v1  ;;  %v486_v5 = vpack.c.bf16 %v81_v3, %v80_v2  ;;  %v166_v7 = vld [vmem:[#allocation6] sm:$0xff]  ;;  %v167_v8 = vld [vmem:[#allocation6 + $0x8] sm:$0xff]  ;;  %v168_v9 = vld [vmem:[#allocation6 + $0x10] sm:$0xff]  ;;  %v489_v11 = vpack.c.bf16 %v83_v6, %v82_v4 }
  0x4b   :  { %v169_v10 = vld [vmem:[#allocation6 + $0x18] sm:$0xff]  ;;  %v492_v12 = vpack.c.bf16 %v167_v8, %v166_v7  ;;  %v170_v14 = vld [vmem:[#allocation6 + $0x20] sm:$0xff]  ;;  %v171_v15 = vld [vmem:[#allocation6 + $0x28] sm:$0xff] }
  0x4c   :  { %487 = vmatpush3.bf16.msra.mxu0 %v486_v5  ;;  %v495_v13 = vpack.c.bf16 %v169_v10, %v168_v9  ;;  %v79_v16 = vld [vmem:[#allocation2] sm:$0xff]  ;;  %v498_v17 = vpack.c.bf16 %v171_v15, %v170_v14  ;;  %v172_v18 = vld [vmem:[#allocation6 + $0x30] sm:$0xff]  ;;  %v174_v21 = vld [vmem:[#allocation6 + $0x40] sm:$0xff] }
  0x4d   :  { %488 = vmatprep.subr.bf16.mxu0 %v648_v0  ;;  %493 = vmatpush3.bf16.msra.mxu1 %v492_v12  ;;  %v173_v19 = vld [vmem:[#allocation6 + $0x38] sm:$0xff]  ;;  %v175_v22 = vld [vmem:[#allocation6 + $0x48] sm:$0xff]  ;;  %v176_v24 = vld [vmem:[#allocation6 + $0x50] sm:$0xff] }
  0x4e   :  { %494 = vmatprep.subr.bf16.mxu1 %v648_v0  ;;  %v501_v20 = vpack.c.bf16 %v173_v19, %v172_v18  ;;  %v504_v23 = vpack.c.bf16 %v175_v22, %v174_v21  ;;  %v177_v25 = vld [vmem:[#allocation6 + $0x58] sm:$0xff]  ;;  %v178_v27 = vld [vmem:[#allocation6 + $0x60] sm:$0xff]  ;;  %v179_v28 = vld [vmem:[#allocation6 + $0x68] sm:$0xff] }
  0x4f   :  { %v507_v26 = vpack.c.bf16 %v177_v25, %v176_v24  ;;  %v510_v29 = vpack.c.bf16 %v179_v28, %v178_v27  ;;  %v180_v30 = vld [vmem:[#allocation6 + $0x70] sm:$0xff]  ;;  %v181_v31 = vld [vmem:[#allocation6 + $0x78] sm:$0xff]  ;;  %v260_v33 = vld [vmem:[#allocation7] sm:$0xff] }
  0x50   :  { %490 = vmatpush3.bf16.msra.mxu0 %v489_v11  ;;  %v513_v32 = vpack.c.bf16 %v181_v31, %v180_v30  ;;  %v261_v34 = vld [vmem:[#allocation7 + $0x8] sm:$0xff]  ;;  %v262_v35 = vld [vmem:[#allocation7 + $0x10] sm:$0xff]  ;;  %v263_v37 = vld [vmem:[#allocation7 + $0x18] sm:$0xff] }
  0x51   :  { %515 = vmatprep.subr.bf16.mxu0 %v648_v0  ;;  %496 = vmatpush3.bf16.msra.mxu1 %v495_v13  ;;  %v516_v36 = vpack.c.bf16 %v261_v34, %v260_v33  ;;  %v519_v38 = vpack.c.bf16 %v263_v37, %v262_v35  ;;  %v264_v39 = vld [vmem:[#allocation7 + $0x20] sm:$0xff]  ;;  %v265_v40 = vld [vmem:[#allocation7 + $0x28] sm:$0xff]  ;;  %v266_v42 = vld [vmem:[#allocation7 + $0x30] sm:$0xff] }
  0x52   :  { %497 = vmatprep.subr.bf16.mxu1 %v648_v0  ;;  %v522_v41 = vpack.c.bf16 %v265_v40, %v264_v39  ;;  %v267_v43 = vld [vmem:[#allocation7 + $0x38] sm:$0xff]  ;;  %v268_v45 = vld [vmem:[#allocation7 + $0x40] sm:$0xff]  ;;  %v269_v46 = vld [vmem:[#allocation7 + $0x48] sm:$0xff] }
  0x53   :  { %413 = vmatmul.mubr.msk.f32.vlgmr.msra.gmra.mrb[0].mxu0 %vm91_vm1, %v79_v16  ;;  %v525_v44 = vpack.c.bf16 %v267_v43, %v266_v42  ;;  %v528_v47 = vpack.c.bf16 %v269_v46, %v268_v45  ;;  %v270_v48 = vld [vmem:[#allocation7 + $0x50] sm:$0xff]  ;;  %v271_v49 = vld [vmem:[#allocation7 + $0x58] sm:$0xff]  ;;  %v272_v51 = vld [vmem:[#allocation7 + $0x60] sm:$0xff] }
  0x54   :  { %482 = vmatprep.mubr.msk.f32.mxu0 %vm649_vm0, %v650_v1  ;;  %517 = vmatpush3.bf16.msra.mxu0 %v516_v36  ;;  %v531_v50 = vpack.c.bf16 %v271_v49, %v270_v48  ;;  %v273_v52 = vld [vmem:[#allocation7 + $0x68] sm:$0xff]  ;;  %v361_v54 = vld [vmem:[%s783_s2] ss:$0 sm:$0xff]  ;;  %v274_v59 = vld [vmem:[#allocation7 + $0x70] sm:$0xff] }
  0x55   :  { %499 = vmatpush3.bf16.msra.mxu1 %v498_v17  ;;  %518 = vmatprep.subr.bf16.mxu0 %v648_v0  ;;  %v534_v53 = vpack.c.bf16 %v273_v52, %v272_v51  ;;  %v275_v60 = vld [vmem:[#allocation7 + $0x78] sm:$0xff] }
  0x56   :  { %500 = vmatprep.subr.bf16.mxu1 %v648_v0  ;;  %v537_v61 = vpack.c.bf16 %v275_v60, %v274_v59  ;;  %v363_v62 = vld [vmem:[%s785_s4] ss:$0 sm:$0xff] }
  0x57   :  { %v364_v3 = vld [vmem:[%s787_s6] ss:$0 sm:$0xff] }
  0x58   :  { %520 = vmatpush3.bf16.msra.mxu0 %v519_v38 }
  0x59   :  { %502 = vmatpush3.bf16.msra.mxu1 %v501_v20  ;;  %521 = vmatprep.subr.bf16.mxu0 %v648_v0 }
  0x5a   :  { %503 = vmatprep.subr.bf16.mxu1 %v648_v0 }
  0x5c   :  { %523 = vmatpush3.bf16.msra.mxu0 %v522_v41 }
  0x5d   :  { %505 = vmatpush3.bf16.msra.mxu1 %v504_v23  ;;  %524 = vmatprep.subr.bf16.mxu0 %v648_v0 }
  0x5e   :  { %506 = vmatprep.subr.bf16.mxu1 %v648_v0 }
  0x60   :  { %526 = vmatpush3.bf16.msra.mxu0 %v525_v44 }
  0x61   :  { %508 = vmatpush3.bf16.msra.mxu1 %v507_v26  ;;  %527 = vmatprep.subr.bf16.mxu0 %v648_v0 }
  0x62   :  { %509 = vmatprep.subr.bf16.mxu1 %v648_v0 }
  0x64   :  { %529 = vmatpush3.bf16.msra.mxu0 %v528_v47 }
  0x65   :  { %511 = vmatpush3.bf16.msra.mxu1 %v510_v29  ;;  %530 = vmatprep.subr.bf16.mxu0 %v648_v0 }
  0x66   :  { %512 = vmatprep.subr.bf16.mxu1 %v648_v0 }
  0x68   :  { %532 = vmatpush3.bf16.msra.mxu0 %v531_v50 }
  0x69   :  { %514 = vmatpush3.bf16.msra.mxu1 %v513_v32  ;;  %533 = vmatprep.subr.bf16.mxu0 %v648_v0 }
  0x6c   :  { %535 = vmatpush3.bf16.msra.mxu0 %v534_v53 }
  0x6d   :  { %536 = vmatprep.subr.bf16.mxu0 %v648_v0 }
  0x70   :  { %538 = vmatpush3.bf16.msra.mxu0 %v537_v61 }
 0x126   :  { %v161_v55 = vpop.f32.mrb[0].mxu0 }
 0x127   :  { %v162_v56 = vadd.f32 %v361_v54, %v161_v55  ;;  %v414_v57 = vpop.f32.mrb[1].mxu0 }
 0x129   :  { %v165_v58 = vmax.f32 %v162_v56, 0.0 }
 0x12b   :  { %448 = vmatmul.mubr.f32.vlgmr.msra.gmra.mrb[0].mxu1 %v165_v58 }
 0x1fe   :  { %v255_v63 = vpop.f32.mrb[0].mxu1 }
 0x1ff   :  { %v256_v1 = vadd.f32 %v363_v62, %v255_v63  ;;  %v449_v0 = vpop.f32.mrb[1].mxu1 }
 0x201   :  { %v259_v2 = vmax.f32 %v256_v1, 0.0 }
 0x203   :  { %483 = vmatmul.mubr.f32.vlgmr.msra.gmra.mrb[2].mxu0 %v259_v2 }
 0x2d6   :  { %v349_v4 = vpop.f32.mrb[2].mxu0 }
 0x2d7   :  { %v350_v5 = vadd.f32 %v364_v3, %v349_v4  ;;  %v484_v6 = vpop.f32.mrb[3].mxu0 }
 0x2d9   :  { %353 = vst [vmem:[%s788_s7] sm:$0xff] %v350_v5 }
 0x2da   :  { %358 = vsyncpa [#allocation3], 1 }
 0x2db   :  { %359 = vsyncpa [#allocation5], 1 }
 0x2dc   :  { %360 = vsyncpa [#allocation8], 1 }

</bundles_post_ra>
